<compile_context>
chip_gen: v5e
topology: v5e:2x2
jax: 0.10.0
libtpu: 0.0.40
codegen_flags: <defaults>
</compile_context>

<pallas_src>
import jax
import jax.numpy as jnp
from jax.experimental import pallas as pl
from jax.experimental.pallas import tpu as pltpu


# ----------------------------------------------------------------------------
# Kernel
# ----------------------------------------------------------------------------
def ffnn_kernel(x_ref, w1t_ref, b1_ref, w2_ref, b2_ref, o_ref):
    # Dropout(0.2) in eval mode == identity (no-op).
    # Cast the streamed tile in-kernel (keeps the HBM stream at native width).
    x = x_ref[...].astype(jnp.bfloat16)                       # (TB, D)
    # Layer 1 on the MXU in "NT" form so the batch dim lands on lanes:
    #   h[H, TB] = W1^T (H, D) contracted with x (TB, D) over D.
    h = jax.lax.dot_general(
        w1t_ref[...], x,
        dimension_numbers=(((1,), (1,)), ((), ())),
        preferred_element_type=jnp.float32)                   # (H, TB) f32
    h = jnp.maximum(h + b1_ref[...], 0.0)                     # bias + ReLU (VPU)
    # Layer 2 (64 -> 1): elementwise multiply + sublane reduce -> lane-dense
    # (1, TB) result (no MXU needed for a degenerate N=1 matmul).
    out = jnp.sum(h * w2_ref[...], axis=0, keepdims=True) + b2_ref[0, 0]
    o_ref[...] = out.astype(o_ref.dtype)


# ----------------------------------------------------------------------------
# Tiling helpers
# ----------------------------------------------------------------------------
def _round_up(n, m):
    return ((n + m - 1) // m) * m


def _cdiv(a, b):
    return (a + b - 1) // b


def _vmem_bytes_estimate(tb, d, h, itemsize):
    """Rough VMEM footprint of one pipelined step (lane/sublane padded)."""
    lanes_d = _round_up(d, 128)
    x_stream = 2 * tb * lanes_d * itemsize        # double-buffered x tiles
    x_cast = tb * lanes_d * 2                     # in-kernel bf16 copy / NT operand
    h_tmp = 3 * _round_up(h, 8) * tb * 4          # h + elementwise temporaries (f32)
    out_buf = 2 * 8 * tb * 4                      # (1, tb) out block, sublane-padded
    weights = 4 * _round_up(h, 8) * lanes_d * 4   # resident weights/biases (padded)
    return x_stream + x_cast + h_tmp + out_buf + weights


def _pick_batch_tile(batch, d, h, itemsize, max_block_b=32768):
    # Target ~2 MiB of streamed x bytes per grid step (~85%+ of HBM roofline),
    # bounded so the lane-padded VMEM working set stays small enough for the
    # v7x 64 MiB / 32 MiB-scoped-default part.
    target_bytes = 2 * 1024 * 1024
    tb = max(128, target_bytes // max(d * itemsize, 1))
    tb = min(tb, max_block_b)
    # Keep >= 2 grid steps for decently sized batches so both v7x TensorCores
    # get work under dimension_semantics=("parallel",).
    if batch > 4096:
        tb = min(tb, _round_up(_cdiv(batch, 2), 128))
    tb = min(tb, _round_up(batch, 128))
    tb = _round_up(tb, 128)

    est = _vmem_bytes_estimate(tb, d, h, itemsize)
    while est > 32 * 1024 * 1024 and tb > 1024:
        tb = _round_up(tb // 2, 128)
        est = _vmem_bytes_estimate(tb, d, h, itemsize)
    vmem_limit = min(48 * 1024 * 1024, max(32 * 1024 * 1024, int(est * 3 // 2)))
    return tb, vmem_limit


# ----------------------------------------------------------------------------
# Wrapper
# ----------------------------------------------------------------------------
def feedforward_nn(x, w1, b1, w2, b2):
    """x: [B, D]; w1: [D, H]; b1: [H]/[1,H]; w2: [H,1]/[1,H]/[H]; b2: scalar-ish."""
    B, D = x.shape
    H = w1.shape[1]

    # One-time weight prep (tiny): transposed bf16 w1 for the NT matmul,
    # column-vector f32 bias / layer-2 weights, SMEM scalar b2.
    w1t = jnp.asarray(w1).T.astype(jnp.bfloat16)             # (H, D)
    b1c = jnp.asarray(b1, jnp.float32).reshape(H, 1)         # (H, 1)
    w2c = jnp.asarray(w2, jnp.float32).reshape(H, 1)         # (H, 1)
    b2s = jnp.asarray(b2, jnp.float32).reshape(1, 1)         # SMEM scalar

    itemsize = jnp.dtype(x.dtype).itemsize
    tb, vmem_limit = _pick_batch_tile(B, D, H, itemsize)
    nt = _cdiv(B, tb)   # last block may be partial; Pallas masks the tail DMA

    out = pl.pallas_call(
        ffnn_kernel,
        out_shape=jax.ShapeDtypeStruct((1, nt * tb), jnp.float32),
        grid=(nt,),
        in_specs=[
            pl.BlockSpec((tb, D), lambda i: (i, 0)),            # x: streamed tiles
            pl.BlockSpec((H, D), lambda i: (0, 0)),             # w1^T: VMEM-resident
            pl.BlockSpec((H, 1), lambda i: (0, 0)),             # b1 column: resident
            pl.BlockSpec((H, 1), lambda i: (0, 0)),             # w2 column: resident
            pl.BlockSpec(memory_space=pltpu.MemorySpace.SMEM),  # b2 scalar in SMEM
        ],
        out_specs=pl.BlockSpec((1, tb), lambda i: (0, i)),      # lane-dense output
        compiler_params=pltpu.CompilerParams(
            dimension_semantics=("parallel",),   # megacore sharding on v7x
            vmem_limit_bytes=vmem_limit,
        ),
        cost_estimate=pl.CostEstimate(
            flops=2 * B * D * H + 3 * B * H,
            transcendentals=0,
            bytes_accessed=B * D * itemsize + B * 4 + H * D * 2 + H * 8 + 4,
        ),
    )(x, w1t, b1c, w2c, b2s)

    # Drop garbage tail lanes from the partial last block; present as (B, 1).
    return out.reshape(nt * tb)[:B].reshape(B, 1)


# ----------------------------------------------------------------------------
# Params / reference
# ----------------------------------------------------------------------------
def init_params(key, input_dim, hidden_dim=64):
    """Deterministic init mimicking torch.nn.Linear (uniform +/- 1/sqrt(fan_in))."""
    k1, k2, k3, k4 = jax.random.split(key, 4)
    bound1 = 1.0 / (input_dim ** 0.5)
    w1 = jax.random.uniform(k1, (input_dim, hidden_dim), jnp.float32, -bound1, bound1)
    b1 = jax.random.uniform(k2, (1, hidden_dim), jnp.float32, -bound1, bound1)
    bound2 = 1.0 / (hidden_dim ** 0.5)
    w2 = jax.random.uniform(k3, (hidden_dim, 1), jnp.float32, -bound2, bound2)
    b2 = jax.random.uniform(k4, (1, 1), jnp.float32, -bound2, bound2)
    return w1, b1, w2, b2


def _reference(x, w1, b1, w2, b2):
    # Same numerics as the kernel: bf16 layer-1 matmul with f32 accumulation,
    # f32 bias/ReLU, f32 layer 2.  Dropout(0.2) = identity (eval mode).
    h = jnp.dot(x.astype(jnp.bfloat16), w1.astype(jnp.bfloat16),
                preferred_element_type=jnp.float32) + b1.reshape(1, -1)
    h = jnp.maximum(h, 0.0)
    return h @ w2.reshape(-1, 1) + b2.reshape(1, 1)


if __name__ == "__main__":
    key = jax.random.PRNGKey(0)
    k_x, k_x2, k_p = jax.random.split(key, 3)

    input_dim = 32     # stands in for X_train.shape[1]
    hidden_dim = 64
    w1, b1, w2, b2 = init_params(k_p, input_dim, hidden_dim)

    # Case 1: small batch (single partial tile).
    x = jax.random.normal(k_x, (8, input_dim), jnp.float32)
    out = jax.block_until_ready(feedforward_nn(x, w1, b1, w2, b2))
    ref = _reference(x, w1, b1, w2, b2)
    assert out.shape == (8, 1)
    assert jnp.allclose(out, ref, atol=2e-3, rtol=2e-3), \
        float(jnp.max(jnp.abs(out - ref)))

    # Case 2: ragged batch (exercises the masked tail DMA + wrapper-side slice).
    x2 = jax.random.normal(k_x2, (13, input_dim), jnp.float32)
    out2 = jax.block_until_ready(feedforward_nn(x2, w1, b1, w2, b2))
    ref2 = _reference(x2, w1, b1, w2, b2)
    assert out2.shape == (13, 1)
    assert jnp.allclose(out2, ref2, atol=2e-3, rtol=2e-3), \
        float(jnp.max(jnp.abs(out2 - ref2)))

    print("KERNEL_OK")
</pallas_src>

<mosaic_0001>
module attributes {stable_mosaic.version = 11 : i64} {
  func.func @ffnn_kernel(%arg0: i32, %arg1: memref<128x32xf32, #tpu.memory_space<vmem>>, %arg2: memref<64x32xbf16, #tpu.memory_space<vmem>>, %arg3: memref<64x1xf32, #tpu.memory_space<vmem>>, %arg4: memref<64x1xf32, #tpu.memory_space<vmem>>, %arg5: memref<1x1xf32, #tpu.memory_space<smem>>, %arg6: memref<1x128xf32, #tpu.memory_space<vmem>>) attributes {dimension_semantics = [#tpu.dimension_semantics<parallel>], iteration_bounds = array<i64: 1>, scalar_prefetch = 0 : i64, scratch_operands = 0 : i64, tpu.core_type = #tpu.core_type<tc>, window_params = [{transform_indices = @transform_0, window_bounds = array<i64: 128, 32>}, {pipeline_mode = #tpu.pipeline_mode<synchronous>, transform_indices = @transform_1, window_bounds = array<i64: 64, 32>}, {pipeline_mode = #tpu.pipeline_mode<synchronous>, transform_indices = @transform_2, window_bounds = array<i64: 64, 1>}, {pipeline_mode = #tpu.pipeline_mode<synchronous>, transform_indices = @transform_3, window_bounds = array<i64: 64, 1>}, {transform_indices = @transform_4, window_bounds = array<i64: 1, 1>}, {transform_indices = @transform_5, window_bounds = array<i64: 1, 128>}]} {
    %c0 = arith.constant 0 : index
    %c0_0 = arith.constant 0 : index
    %0 = vector.load %arg1[%c0, %c0_0] : memref<128x32xf32, #tpu.memory_space<vmem>>, vector<128x32xf32>
    %1 = arith.truncf %0 : vector<128x32xf32> to vector<128x32xbf16>
    %c0_1 = arith.constant 0 : index
    %c0_2 = arith.constant 0 : index
    %2 = vector.load %arg2[%c0_1, %c0_2] : memref<64x32xbf16, #tpu.memory_space<vmem>>, vector<64x32xbf16>
    %cst = arith.constant dense<0.000000e+00> : vector<64x128xf32>
    %3 = tpu.matmul %2, %1, %cst {dimension_numbers = #tpu.dot_dimension_numbers<[1], [1], [0], [0], [0, 0, 1, 0], [], []>} : vector<64x32xbf16>, vector<128x32xbf16>, vector<64x128xf32> -> vector<64x128xf32>
    %c0_3 = arith.constant 0 : index
    %c0_4 = arith.constant 0 : index
    %4 = vector.load %arg3[%c0_3, %c0_4] : memref<64x1xf32, #tpu.memory_space<vmem>>, vector<64x1xf32>
    %5 = vector.broadcast %4 : vector<64x1xf32> to vector<64x128xf32>
    %6 = arith.addf %3, %5 : vector<64x128xf32>
    %cst_5 = arith.constant 0.000000e+00 : f32
    %7 = vector.broadcast %cst_5 : f32 to vector<64x128xf32>
    %8 = arith.maximumf %6, %7 : vector<64x128xf32>
    %c0_6 = arith.constant 0 : index
    %c0_7 = arith.constant 0 : index
    %9 = vector.load %arg4[%c0_6, %c0_7] : memref<64x1xf32, #tpu.memory_space<vmem>>, vector<64x1xf32>
    %10 = vector.broadcast %9 : vector<64x1xf32> to vector<64x128xf32>
    %11 = arith.mulf %8, %10 : vector<64x128xf32>
    %cst_8 = arith.constant dense<0.000000e+00> : vector<128xf32>
    %12 = vector.multi_reduction <add>, %11, %cst_8 [0] : vector<64x128xf32> to vector<128xf32>
    %13 = vector.shape_cast %12 : vector<128xf32> to vector<1x128xf32>
    %c0_9 = arith.constant 0 : index
    %c0_10 = arith.constant 0 : index
    %14 = memref.load %arg5[%c0_9, %c0_10] : memref<1x1xf32, #tpu.memory_space<smem>>
    %15 = vector.broadcast %14 : f32 to vector<1x128xf32>
    %16 = arith.addf %13, %15 : vector<1x128xf32>
    %c0_11 = arith.constant 0 : index
    %c0_12 = arith.constant 0 : index
    %17 = vector.load %arg6[%c0_11, %c0_12] : memref<1x128xf32, #tpu.memory_space<vmem>>, vector<1x128xf32>
    tpu.vector_store %arg6[%c0_11, %c0_12], %16 {strides = array<i32>} : memref<1x128xf32, #tpu.memory_space<vmem>>, vector<1x128xf32>,
    return
  }
  func.func @transform_0(%arg0: i32) -> (i32, i32) {
    %c0_i32 = arith.constant 0 : i32
    %c0_i32_0 = arith.constant 0 : i32
    return %arg0, %c0_i32 : i32, i32
  }
  func.func @transform_1(%arg0: i32) -> (i32, i32) {
    %c0_i32 = arith.constant 0 : i32
    %c0_i32_0 = arith.constant 0 : i32
    %c0_i32_1 = arith.constant 0 : i32
    return %c0_i32, %c0_i32_0 : i32, i32
  }
  func.func @transform_2(%arg0: i32) -> (i32, i32) {
    %c0_i32 = arith.constant 0 : i32
    %c0_i32_0 = arith.constant 0 : i32
    %c0_i32_1 = arith.constant 0 : i32
    return %c0_i32, %c0_i32_0 : i32, i32
  }
  func.func @transform_3(%arg0: i32) -> (i32, i32) {
    %c0_i32 = arith.constant 0 : i32
    %c0_i32_0 = arith.constant 0 : i32
    %c0_i32_1 = arith.constant 0 : i32
    return %c0_i32, %c0_i32_0 : i32, i32
  }
  func.func @transform_4(%arg0: i32) -> (i32, i32) {
    %c0_i32 = arith.constant 0 : i32
    %c0_i32_0 = arith.constant 0 : i32
    %c0_i32_1 = arith.constant 0 : i32
    return %c0_i32, %c0_i32_0 : i32, i32
  }
  func.func @transform_5(%arg0: i32) -> (i32, i32) {
    %c0_i32 = arith.constant 0 : i32
    %c0_i32_0 = arith.constant 0 : i32
    return %c0_i32, %arg0 : i32, i32
  }
}

</mosaic_0001>

<bundles_post_ra>
// kernel: tpu_custom_call.1
= control target key start
LH: loop header
LB: loop body
LE: loop exit
PB: predicated region body
PF: predicated region fallthrough
CT: control target
= control target key end

     0   :  { %vm122_vm0 = vcmask 261120   ;;  %v364_v3 = vmov 0   ;;  %s522_s0 = inlined_call_operand.vmem [shape: f32[8,32], index: 0, kind: input, shape index: {}]   ;;  %s523_s1 = inlined_call_operand.vmem [shape: bf16[64,32], index: 1, kind: input, shape index: {}]   ;;  %s524_s2 = inlined_call_operand.vmem [shape: f32[64,1], index: 2, kind: input, shape index: {}]   ;;  %s525_s3 = inlined_call_operand.vmem [shape: f32[64,1], index: 3, kind: input, shape index: {}]   ;;  %s526_s4 = inlined_call_operand.<no memory space> [shape: f32[1,1], index: 4, kind: input, shape index: {}]   ;;  %s527_s5 = inlined_call_operand.hbm [shape: f32[1,128], index: 5, kind: output, shape index: {}]  }
   0x1   :  { %v36_v0 = vld [vmem:[%s522_s0 + $0x70] sm:$0xff]  ;;  %v37_v1 = vld [vmem:[%s522_s0 + $0x78] sm:$0xff]  ;;  %335 = vset.pattern.permute.xlu0 %v364_v3  ;;  %336 = vset.pattern.permute.xlu1 %v364_v3  ;;  %v34_v4 = vld [vmem:[%s522_s0 + $0x60] sm:$0xff] }
   0x2   :  { %v45_v2 = vpack.c.bf16 %v37_v1, %v36_v0  ;;  %v35_v5 = vld [vmem:[%s522_s0 + $0x68] sm:$0xff]  ;;  %v54_v6 = vld [vmem:[%s524_s2] sm:$0xff]  ;;  %337 = vset.pattern.permute.xlu2 %v364_v3  ;;  %v56_v8 = vld [vmem:[%s524_s2 + $0x10] sm:$0xff] }
   0x3   :  { %64 = vperm.xlu0 %335, %v54_v6  }
   0x4   :  { %v157_v7 = vsel %vm122_vm0, %v45_v2, 0 }
   0x5   :  { %159 = vmatpush.bf16.xpose.msra.mxu0 %v157_v7  ;;  %309 = vmatpush.bf16.xpose.msra.mxu1 %v157_v7 }
   0x6   :  { %11 = vsyncpa [#allocation4], 0  ;;  %310 = vmatpush.bf16.xpose.msra.mxu2 %v157_v7  ;;  %311 = vmatpush.bf16.xpose.msra.mxu3 %v157_v7  ;;  %v44_v9 = vpack.c.bf16 %v35_v5, %v34_v4  ;;  %v55_v10 = vld [vmem:[%s524_s2 + $0x8] sm:$0xff]  ;;  %v32_v12 = vld [vmem:[%s522_s0 + $0x50] sm:$0xff]  ;;  %s365_s13 = smov [#allocation3]   ;;  %s276_s17 = sshll.u32 %s527_s5, 4  ;;  %s277_s17 = int_to_ptr.hbm [resolvable:$true] %s276_s17 }
   0x7   :  { %74 = vperm.xlu1 %336, %v56_v8   ;;  %v33_v13 = vld [vmem:[%s522_s0 + $0x58] sm:$0xff]  ;;  %v197_v16 = vld [vmem:[%s525_s3 + $0x8] sm:$0xff]  ;;  %v30_v18 = vld [vmem:[%s522_s0 + $0x40] sm:$0xff]  ;;  %s274_s14 = sshll.u32 %s365_s13, 4  ;;  %s275_s14 = int_to_ptr.vmem [resolvable:$true] %s274_s14 }
   0x8   :  { %v154_v11 = vsel %vm122_vm0, %v44_v9, 0  ;;  %v57_v14 = vld [vmem:[%s524_s2 + $0x18] sm:$0xff]  ;;  %v43_v15 = vpack.c.bf16 %v33_v13, %v32_v12  ;;  %v31_v19 = vld [vmem:[%s522_s0 + $0x48] sm:$0xff]  ;;  %v198_v20 = vld [vmem:[%s525_s3 + $0x10] sm:$0xff] }
   0x9   :  { %v42_v21 = vpack.c.bf16 %v31_v19, %v30_v18  ;;  %v58_v22 = vld [vmem:[%s524_s2 + $0x20] sm:$0xff]  ;;  %v199_v23 = vld [vmem:[%s525_s3 + $0x18] sm:$0xff]  ;;  %v28_v25 = vld [vmem:[%s522_s0 + $0x30] sm:$0xff] }
   0xa   :  { %v151_v17 = vsel %vm122_vm0, %v43_v15, 0  ;;  %84 = vperm.xlu2 %337, %v58_v22   ;;  %v29_v26 = vld [vmem:[%s522_s0 + $0x38] sm:$0xff]  ;;  %v60_v27 = vld [vmem:[%s524_s2 + $0x30] sm:$0xff]  ;;  %v26_v31 = vld [vmem:[%s522_s0 + $0x20] sm:$0xff] }
   0xb   :  { %69 = vperm.xlu0 %335, %v55_v10   ;;  %v148_v24 = vsel %vm122_vm0, %v42_v21, 0  ;;  %v41_v28 = vpack.c.bf16 %v29_v26, %v28_v25  ;;  %v61_v29 = vld [vmem:[%s524_s2 + $0x38] sm:$0xff]  ;;  %v27_v32 = vld [vmem:[%s522_s0 + $0x28] sm:$0xff]  ;;  %v196_v34 = vld [vmem:[%s525_s3] sm:$0xff] }
   0xc   :  { %v201_v33 = vld [vmem:[%s525_s3 + $0x28] sm:$0xff]  ;;  %v40_v35 = vpack.c.bf16 %v27_v32, %v26_v31  ;;  %v203_v36 = vld [vmem:[%s525_s3 + $0x38] sm:$0xff]  ;;  %v24_v38 = vld [vmem:[%s522_s0 + $0x10] sm:$0xff] }
   0xd   :  { %160 = vmatpush.bf16.xpose.msra.mxu0 %v154_v11  ;;  %312 = vmatpush.bf16.xpose.msra.mxu1 %v154_v11  ;;  %v145_v30 = vsel %vm122_vm0, %v41_v28, 0  ;;  %v25_v39 = vld [vmem:[%s522_s0 + $0x18] sm:$0xff]  ;;  %v59_v40 = vld [vmem:[%s524_s2 + $0x28] sm:$0xff]  ;;  %v22_v43 = vld [vmem:[%s522_s0] sm:$0xff] }
   0xe   :  { %313 = vmatpush.bf16.xpose.msra.mxu2 %v154_v11  ;;  %314 = vmatpush.bf16.xpose.msra.mxu3 %v154_v11  ;;  %v142_v37 = vsel %vm122_vm0, %v40_v35, 0  ;;  %v39_v41 = vpack.c.bf16 %v25_v39, %v24_v38  ;;  %v23_v44 = vld [vmem:[%s522_s0 + $0x8] sm:$0xff]  ;;  %v200_v45 = vld [vmem:[%s525_s3 + $0x20] sm:$0xff]  ;;  %v202_v48 = vld [vmem:[%s525_s3 + $0x30] sm:$0xff] }
   0xf   :  { %79 = vperm.xlu1 %336, %v57_v14   ;;  %v38_v46 = vpack.c.bf16 %v23_v44, %v22_v43  ;;  %v305_v49 = vld [vmem:[%s523_s1] sm:$0xff]  ;;  %v306_v50 = vld [vmem:[%s523_s1 + $0x8] sm:$0xff]  ;;  %v307_v51 = vld [vmem:[%s523_s1 + $0x10] sm:$0xff] }
  0x10   :  { %v139_v42 = vsel %vm122_vm0, %v39_v41, 0  ;;  %v308_v52 = vld [vmem:[%s523_s1 + $0x18] sm:$0xff] }
  0x11   :  { %v136_v47 = vsel %vm122_vm0, %v38_v46, 0 }
  0x12   :  { %206 = vperm.xlu2 %337, %v196_v34  }
  0x13   :  { %211 = vperm.xlu0 %335, %v197_v16  }
  0x15   :  { %161 = vmatpush.bf16.xpose.msra.mxu0 %v151_v17  ;;  %315 = vmatpush.bf16.xpose.msra.mxu1 %v151_v17 }
  0x16   :  { %316 = vmatpush.bf16.xpose.msra.mxu2 %v151_v17  ;;  %317 = vmatpush.bf16.xpose.msra.mxu3 %v151_v17 }
  0x17   :  { %216 = vperm.xlu1 %336, %v198_v20  }
  0x1a   :  { %89 = vperm.xlu2 %337, %v59_v40  }
  0x1b   :  { %221 = vperm.xlu0 %335, %v199_v23  }
  0x1d   :  { %162 = vmatpush.bf16.xpose.msra.mxu0 %v148_v24  ;;  %318 = vmatpush.bf16.xpose.msra.mxu1 %v148_v24 }
  0x1e   :  { %319 = vmatpush.bf16.xpose.msra.mxu2 %v148_v24  ;;  %320 = vmatpush.bf16.xpose.msra.mxu3 %v148_v24 }
  0x1f   :  { %94 = vperm.xlu1 %336, %v60_v27  }
  0x22   :  { %226 = vperm.xlu2 %337, %v200_v45  }
  0x23   :  { %99 = vperm.xlu0 %335, %v61_v29  }
  0x25   :  { %163 = vmatpush.bf16.xpose.msra.mxu0 %v145_v30  ;;  %321 = vmatpush.bf16.xpose.msra.mxu1 %v145_v30 }
  0x26   :  { %322 = vmatpush.bf16.xpose.msra.mxu2 %v145_v30  ;;  %323 = vmatpush.bf16.xpose.msra.mxu3 %v145_v30 }
  0x27   :  { %231 = vperm.xlu1 %336, %v201_v33  }
  0x2a   :  { %236 = vperm.xlu2 %337, %v202_v48  }
  0x2b   :  { %241 = vperm.xlu0 %335, %v203_v36  }
  0x2d   :  { %164 = vmatpush.bf16.xpose.msra.mxu0 %v142_v37  ;;  %324 = vmatpush.bf16.xpose.msra.mxu1 %v142_v37 }
  0x2e   :  { %325 = vmatpush.bf16.xpose.msra.mxu2 %v142_v37  ;;  %326 = vmatpush.bf16.xpose.msra.mxu3 %v142_v37 }
  0x35   :  { %165 = vmatpush.bf16.xpose.msra.mxu0 %v139_v42  ;;  %327 = vmatpush.bf16.xpose.msra.mxu1 %v139_v42 }
  0x36   :  { %328 = vmatpush.bf16.xpose.msra.mxu2 %v139_v42  ;;  %329 = vmatpush.bf16.xpose.msra.mxu3 %v139_v42 }
  0x3d   :  { %166 = vmatpush.bf16.xpose.msra.mxu0 %v136_v47  ;;  %330 = vmatpush.bf16.xpose.msra.mxu1 %v136_v47 }
  0x3e   :  { %331 = vmatpush.bf16.xpose.msra.mxu2 %v136_v47  ;;  %332 = vmatpush.bf16.xpose.msra.mxu3 %v136_v47 }
  0x44   :  { %301 = vmatmul.msk.bf16.vlgmr.msra.gmra.mxu0 %vm122_vm0, %v305_v49  ;;  %302 = vmatmul.msk.bf16.vlgmr.msra.gmra.mxu1 %vm122_vm0, %v306_v50  ;;  %v266_v49 = vstv %s526_s4 }
  0x45   :  { %303 = vmatmul.msk.bf16.vlgmr.msra.gmra.mxu2 %vm122_vm0, %v307_v51  ;;  %304 = vmatmul.msk.bf16.vlgmr.msra.gmra.mxu3 %vm122_vm0, %v308_v52 }
  0x64   :  { %v85_v55 = vpop.permute.xlu2 %84 }
  0x6c   :  { %v207_v58 = vpop.permute.xlu2 %206 }
  0x74   :  { %v90_v63 = vpop.permute.xlu2 %89 }
  0x75   :  { %v65_v53 = vpop.permute.xlu0 %64 }
  0x79   :  { %v75_v54 = vpop.permute.xlu1 %74 }
  0x7c   :  { %v227_v14 = vpop.permute.xlu2 %226 }
  0x7d   :  { %v70_v56 = vpop.permute.xlu0 %69 }
  0x81   :  { %v80_v57 = vpop.permute.xlu1 %79 }
  0x84   :  { %v237_v37 = vpop.permute.xlu2 %236 }
  0x85   :  { %v212_v59 = vpop.permute.xlu0 %211 }
  0x89   :  { %v217_v60 = vpop.permute.xlu1 %216 }
  0x8d   :  { %v222_v0 = vpop.permute.xlu0 %221 }
  0x91   :  { %v95_v10 = vpop.permute.xlu1 %94 }
  0x95   :  { %v100_v18 = vpop.permute.xlu0 %99 }
  0x99   :  { %v232_v33 = vpop.permute.xlu1 %231 }
  0x9d   :  { %v242_v40 = vpop.permute.xlu0 %241 }
  0xc1   :  { %v168_v61 = vpop.f32.mrf.mxu0  ;;  %v173_v62 = vpop.f32.mrf.mxu1 }
  0xc2   :  { %v169_v1 = vadd.f32 %v168_v61, %v65_v53  ;;  %v174_v2 = vadd.f32 %v173_v62, %v75_v54 }
  0xc4   :  { %v188_v7 = vmax.f32 %v169_v1, 0.0  ;;  %v190_v11 = vmax.f32 %v174_v2, 0.0 }
  0xc6   :  { %v244_v15 = vmul.f32 %v207_v58, %v188_v7  ;;  %v246_v19 = vmul.f32 %v217_v60, %v190_v11 }
  0xc8   :  { %v178_v3 = vpop.f32.mrf.mxu2  ;;  %v183_v4 = vpop.f32.mrf.mxu3 }
  0xc9   :  { %v170_v5 = vpop.f32.mrf.mxu0  ;;  %v175_v6 = vpop.f32.mrf.mxu1  ;;  %v179_v12 = vadd.f32 %v178_v3, %v85_v55  ;;  %v184_v21 = vadd.f32 %v183_v4, %v95_v10 }
  0xca   :  { %v171_v8 = vadd.f32 %v170_v5, %v70_v56  ;;  %v176_v9 = vadd.f32 %v175_v6, %v80_v57 }
  0xcb   :  { %v192_v20 = vmax.f32 %v179_v12, 0.0  ;;  %v194_v31 = vmax.f32 %v184_v21, 0.0 }
  0xcc   :  { %v189_v13 = vmax.f32 %v171_v8, 0.0  ;;  %v191_v17 = vmax.f32 %v176_v9, 0.0 }
  0xcd   :  { %v248_v30 = vmul.f32 %v227_v14, %v192_v20  ;;  %v250_v38 = vmul.f32 %v237_v37, %v194_v31 }
  0xce   :  { %v245_v16 = vmul.f32 %v212_v59, %v189_v13  ;;  %v247_v26 = vmul.f32 %v222_v0, %v191_v17 }
  0xd0   :  { %v252_v22 = vadd.f32 %v245_v16, %v244_v15  ;;  %v180_v23 = vpop.f32.mrf.mxu2  ;;  %v185_v24 = vpop.f32.mrf.mxu3 }
  0xd1   :  { %v181_v25 = vadd.f32 %v180_v23, %v90_v63  ;;  %v186_v28 = vadd.f32 %v185_v24, %v100_v18 }
  0xd2   :  { %v253_v27 = vadd.f32 %v252_v22, %v246_v19 }
  0xd3   :  { %v193_v29 = vmax.f32 %v181_v25, 0.0  ;;  %v195_v36 = vmax.f32 %v186_v28, 0.0 }
  0xd4   :  { %v254_v32 = vadd.f32 %v253_v27, %v247_v26 }
  0xd5   :  { %v249_v34 = vmul.f32 %v232_v33, %v193_v29  ;;  %v251_v41 = vmul.f32 %v242_v40, %v195_v36 }
  0xd6   :  { %v255_v35 = vadd.f32 %v254_v32, %v248_v30 }
  0xd8   :  { %v256_v39 = vadd.f32 %v255_v35, %v249_v34 }
  0xda   :  { %v257_v42 = vadd.f32 %v256_v39, %v250_v38 }
  0xdc   :  { %v258_v43 = vadd.f32 %v257_v42, %v251_v41 }
  0xde   :  { %v259_v44 = vrot.slane %v258_v43, 4 }
  0xe0   :  { %v260_v45 = vadd.f32 %v259_v44, %v258_v43 }
  0xe2   :  { %v261_v46 = vrot.slane %v260_v45, 2 }
  0xe4   :  { %v262_v47 = vadd.f32 %v261_v46, %v260_v45 }
  0xe6   :  { %v263_v48 = vrot.slane %v262_v47, 1 }
  0xe8   :  { %v264_v50 = vadd.f32 %v263_v48, %v262_v47 }
  0xea   :  { %v267_v51 = vadd.f32 %v266_v49, %v264_v50 }
  0xec   :  { %268 = vst [vmem:[#allocation3] sm:$0x1] %v267_v51 }
  0xed   :  { %279 = dma.vmem_to_hbm [thread:$0]  %s275_s14, 16, %s277_s17, [#allocation4]  }
  0xee   :  { %362 = dma.done.wait [#allocation4], 16  }
  0xef   :  { %363 = vsyncadd [#allocation4], 4294967280 }
  0xf0   :  { %284 = vsyncpa [#allocation4], 1 }

</bundles_post_ra>
